<compile_context>
chip_gen: v7x
topology: tpu7x:2x2x1
jax: 0.10.0
libtpu: 0.0.40
codegen_flags: <defaults>
</compile_context>

<pallas_src>
import jax
import jax.numpy as jnp
from jax.experimental import pallas as pl
from jax.experimental.pallas import tpu as pltpu


# ----------------------------------------------------------------------------
# Parameter fusion (glue, plain JAX) — replicates Conv3XC.update_params()
# ----------------------------------------------------------------------------
def _fuse_conv3xc(params):
    """Fuse (1x1 -> 3x3 -> 1x1) conv chain + padded 1x1 skip into one 3x3 conv.

    Returns (weight_hwio (3,3,Cin,Cout), bias (Cout,)).
    """
    w1, b1 = params["w1"], params["b1"]      # (2C, C, 1, 1), (2C,)
    w2, b2 = params["w2"], params["b2"]      # (2C, 2C, 3, 3), (2C,)
    w3, b3 = params["w3"], params["b3"]      # (C, 2C, 1, 1), (C,)
    skw, skb = params["skw"], params["skb"]  # (C, C, 1, 1), (C,)

    w1_ = w1[:, :, 0, 0]                                   # (2C, C)
    w12 = jnp.einsum("omyx,mi->oiyx", w2, w1_)             # (2C, C, 3, 3)
    b12 = jnp.einsum("omyx,m->o", w2, b1) + b2             # (2C,)
    w3_ = w3[:, :, 0, 0]                                   # (C, 2C)
    wc = jnp.einsum("om,miyx->oiyx", w3_, w12)             # (C, C, 3, 3) OIHW
    bc = w3_ @ b12 + b3                                    # (C,)
    # add the 1x1 skip at the center tap (F.pad(sk_w, [1,1,1,1]))
    wc = wc.at[:, :, 1, 1].add(skw[:, :, 0, 0])
    bc = bc + skb
    # OIHW -> HWIO
    return jnp.transpose(wc, (2, 3, 1, 0)), bc


def _banded_weights(w_hwio, w_dim):
    """(3,3,Cin,Cout) HWIO -> (3, W*Cin, W*Cout) block-banded matrices.

    M[ky][x_in*Cin+ci, x_out*Cout+co] = w[ky, x_in-x_out+1, ci, co] when
    x_in - x_out in {-1, 0, 1}, else 0.  Contracting a lane-dense row
    (W*Cin lanes) with M[ky] performs the kx sweep and channel mix of the 3x3
    conv; zero padding in x is implicit in the band structure.
    """
    _, _, cin, cout = w_hwio.shape
    xi = jnp.arange(w_dim)[:, None]
    xo = jnp.arange(w_dim)[None, :]
    kx = xi - xo + 1                                       # (W, W)
    valid = (kx >= 0) & (kx <= 2)
    kx_c = jnp.clip(kx, 0, 2)
    mats = []
    for ky in range(3):
        blk = w_hwio[ky][kx_c]                             # (W, W, Cin, Cout)
        blk = jnp.where(valid[:, :, None, None], blk, 0.0)
        mats.append(jnp.transpose(blk, (0, 2, 1, 3)).reshape(w_dim * cin,
                                                             w_dim * cout))
    return jnp.stack(mats, axis=0)                         # (3, W*Cin, W*Cout)


# ----------------------------------------------------------------------------
# Pallas kernel
# ----------------------------------------------------------------------------
def _mish(v):
    # mish(x) = x * tanh(softplus(x)) = x * m/(m+2), m = e^x (e^x + 2).
    # One EUP exp (+ a divide) instead of exp + log1p + tanh.
    e = jnp.exp(jnp.minimum(v, 20.0))   # clamp: for v > 20, m/(m+2) == 1 in f32
    m = e * (e + 2.0)
    return v * (m / (m + 2.0))


def spab_kernel(x_ref, w1_ref, b1_ref, w2_ref, b2_ref, w3_ref, b3_ref,
                out_ref, buf):
    # x_ref/out_ref: (1, H, W*C) lane-dense.  buf: (H+2, W*C) VMEM scratch.
    H, WC = out_ref.shape[1], out_ref.shape[2]

    # Zero only the two halo rows (interior rows [1:H+1] are fully rewritten
    # before every conv).  Done unconditionally every step so megacore grid
    # sharding (per-core scratch) stays correct.
    zrow = jnp.zeros((1, WC), jnp.float32)
    buf[0:1, :] = zrow
    buf[H + 1:H + 2, :] = zrow

    def conv3x3(w_ref, b_ref):
        # Three lane-dense MXU matmuls (K = N = W*C), bias folded into the
        # first tap.  (For v6e/v7x, operands could be cast to bf16 here.)
        acc = jnp.dot(buf[0:H, :], w_ref[0],
                      preferred_element_type=jnp.float32) + b_ref[...]
        for ky in (1, 2):
            acc = acc + jnp.dot(buf[ky:ky + H, :], w_ref[ky],
                                preferred_element_type=jnp.float32)
        return acc

    x = x_ref[0].astype(jnp.float32)            # (H, W*C)

    buf[1:H + 1, :] = x                         # stage conv1 input (row halo)
    out1 = conv3x3(w1_ref, b1_ref)              # c1_r(x)
    buf[1:H + 1, :] = _mish(out1)
    out2 = conv3x3(w2_ref, b2_ref)              # c2_r(mish(out1))
    buf[1:H + 1, :] = _mish(out2)
    out3 = conv3x3(w3_ref, b3_ref)              # c3_r(mish(out2))

    sim_att = jax.nn.sigmoid(out3) - 0.5
    out_ref[0] = ((out3 + x) * sim_att).astype(out_ref.dtype)


# ----------------------------------------------------------------------------
# Wrapper
# ----------------------------------------------------------------------------
def spab_forward(x_nchw, fused_params):
    """SPAB.forward with end=False.  x_nchw: (N, C, H, W) float32."""
    N, C, H, W = x_nchw.shape
    WC = W * C
    # NCHW -> NHWC -> lane-dense (N, H, W*C); no HBM-side spatial pad.
    x = jnp.transpose(x_nchw, (0, 2, 3, 1)).reshape(N, H, WC)

    packed = []
    for (w, b) in fused_params:
        packed.append(_banded_weights(w, W))                 # (3, WC, WC)
        packed.append(jnp.tile(b, W).reshape(1, WC))         # (1, WC)
    w1m, b1r, w2m, b2r, w3m, b3r = packed

    def const_spec(shape):
        return pl.BlockSpec(shape, lambda n: (0,) * len(shape))

    out = pl.pallas_call(
        spab_kernel,
        out_shape=jax.ShapeDtypeStruct((N, H, WC), x.dtype),
        grid_spec=pltpu.PrefetchScalarGridSpec(
            num_scalar_prefetch=0,
            grid=(N,),
            in_specs=[
                pl.BlockSpec((1, H, WC), lambda n: (n, 0, 0)),
                const_spec((3, WC, WC)), const_spec((1, WC)),
                const_spec((3, WC, WC)), const_spec((1, WC)),
                const_spec((3, WC, WC)), const_spec((1, WC)),
            ],
            out_specs=pl.BlockSpec((1, H, WC), lambda n: (n, 0, 0)),
            scratch_shapes=[pltpu.VMEM((H + 2, WC), jnp.float32)],
        ),
        compiler_params=pltpu.CompilerParams(
            dimension_semantics=("parallel",)),
    )(x, w1m, b1r, w2m, b2r, w3m, b3r)

    out = out.reshape(N, H, W, C)
    return jnp.transpose(out, (0, 3, 1, 2))                  # back to NCHW


# ----------------------------------------------------------------------------
# Pure-JAX reference (for correctness check only)
# ----------------------------------------------------------------------------
def _mish_ref(v):
    return v * jnp.tanh(jax.nn.softplus(v))


def _spab_reference(x_nchw, fused_params):
    x = jnp.transpose(x_nchw, (0, 2, 3, 1))

    def conv(h, wb):
        w, b = wb
        y = jax.lax.conv_general_dilated(
            h, w, (1, 1), "SAME",
            dimension_numbers=("NHWC", "HWIO", "NHWC"))
        return y + b

    out1 = conv(x, fused_params[0])
    out2 = conv(_mish_ref(out1), fused_params[1])
    out3 = conv(_mish_ref(out2), fused_params[2])
    sim = jax.nn.sigmoid(out3) - 0.5
    out = (out3 + x) * sim
    return jnp.transpose(out, (0, 3, 1, 2))


# ----------------------------------------------------------------------------
if __name__ == "__main__":
    key = jax.random.PRNGKey(0)
    N, C, H, W = 2, 8, 16, 16        # W*C = 128 -> fully lane-dense
    gain = 2

    keys = jax.random.split(key, 4)
    x = jax.random.normal(keys[0], (N, C, H, W), jnp.float32)

    def make_conv3xc_params(k, c):
        ks = jax.random.split(k, 8)
        return {
            "w1": 0.10 * jax.random.normal(ks[0], (c * gain, c, 1, 1), jnp.float32),
            "b1": 0.05 * jax.random.normal(ks[1], (c * gain,), jnp.float32),
            "w2": 0.10 * jax.random.normal(ks[2], (c * gain, c * gain, 3, 3), jnp.float32),
            "b2": 0.05 * jax.random.normal(ks[3], (c * gain,), jnp.float32),
            "w3": 0.10 * jax.random.normal(ks[4], (c, c * gain, 1, 1), jnp.float32),
            "b3": 0.05 * jax.random.normal(ks[5], (c,), jnp.float32),
            "skw": 0.02 * jax.random.normal(ks[6], (c, c, 1, 1), jnp.float32),
            "skb": 0.05 * jax.random.normal(ks[7], (c,), jnp.float32),
        }

    # Three Conv3XC blocks (c1_r, c2_r, c3_r), each fused to a single 3x3 conv.
    fused = [_fuse_conv3xc(make_conv3xc_params(keys[i + 1], C)) for i in range(3)]

    run = jax.jit(spab_forward)
    out = jax.block_until_ready(run(x, fused))

    ref = _spab_reference(x, fused)
    max_err = float(jnp.max(jnp.abs(out - ref)))
    assert jnp.allclose(out, ref, atol=2e-4, rtol=2e-4), max_err

    # TODO(synk): `end=True` variant (also returns out1) and W/row-band tiling
    # for large SR shapes (W*C >> 128) are omitted; SPAB defaults to end=False.
    print("KERNEL_OK")
</pallas_src>

<mosaic_0001>
module attributes {stable_mosaic.version = 11 : i64} {
  func.func @spab_kernel(%arg0: i32, %arg1: memref<1x16x128xf32, #tpu.memory_space<vmem>>, %arg2: memref<3x128x128xf32, #tpu.memory_space<vmem>>, %arg3: memref<1x128xf32, #tpu.memory_space<vmem>>, %arg4: memref<3x128x128xf32, #tpu.memory_space<vmem>>, %arg5: memref<1x128xf32, #tpu.memory_space<vmem>>, %arg6: memref<3x128x128xf32, #tpu.memory_space<vmem>>, %arg7: memref<1x128xf32, #tpu.memory_space<vmem>>, %arg8: memref<1x16x128xf32, #tpu.memory_space<vmem>>, %arg9: memref<18x128xf32, #tpu.memory_space<vmem>>) attributes {dimension_semantics = [#tpu.dimension_semantics<parallel>], iteration_bounds = array<i64: 2>, scalar_prefetch = 0 : i64, scratch_operands = 1 : i64, tpu.core_type = #tpu.core_type<tc>, window_params = [{transform_indices = @transform_0, window_bounds = array<i64: 1, 16, 128>}, {pipeline_mode = #tpu.pipeline_mode<synchronous>, transform_indices = @transform_1, window_bounds = array<i64: 3, 128, 128>}, {pipeline_mode = #tpu.pipeline_mode<synchronous>, transform_indices = @transform_2, window_bounds = array<i64: 1, 128>}, {pipeline_mode = #tpu.pipeline_mode<synchronous>, transform_indices = @transform_3, window_bounds = array<i64: 3, 128, 128>}, {pipeline_mode = #tpu.pipeline_mode<synchronous>, transform_indices = @transform_4, window_bounds = array<i64: 1, 128>}, {pipeline_mode = #tpu.pipeline_mode<synchronous>, transform_indices = @transform_5, window_bounds = array<i64: 3, 128, 128>}, {pipeline_mode = #tpu.pipeline_mode<synchronous>, transform_indices = @transform_6, window_bounds = array<i64: 1, 128>}, {transform_indices = @transform_7, window_bounds = array<i64: 1, 16, 128>}]} {
    %cst = arith.constant 0.000000e+00 : f32
    %0 = vector.broadcast %cst : f32 to vector<1x128xf32>
    %c0 = arith.constant 0 : index
    %c0_0 = arith.constant 0 : index
    %1 = vector.load %arg9[%c0, %c0_0] : memref<18x128xf32, #tpu.memory_space<vmem>>, vector<1x128xf32>
    tpu.vector_store %arg9[%c0, %c0_0], %0 {strides = array<i32>} : memref<18x128xf32, #tpu.memory_space<vmem>>, vector<1x128xf32>,
    %c17 = arith.constant 17 : index
    %c0_1 = arith.constant 0 : index
    %2 = vector.load %arg9[%c17, %c0_1] : memref<18x128xf32, #tpu.memory_space<vmem>>, vector<1x128xf32>
    tpu.vector_store %arg9[%c17, %c0_1], %0 {strides = array<i32>} : memref<18x128xf32, #tpu.memory_space<vmem>>, vector<1x128xf32>,
    %c0_2 = arith.constant 0 : index
    %c0_3 = arith.constant 0 : index
    %c0_4 = arith.constant 0 : index
    %3 = vector.load %arg1[%c0_2, %c0_3, %c0_4] : memref<1x16x128xf32, #tpu.memory_space<vmem>>, vector<1x16x128xf32>
    %4 = vector.shape_cast %3 : vector<1x16x128xf32> to vector<16x128xf32>
    %c1 = arith.constant 1 : index
    %c0_5 = arith.constant 0 : index
    %5 = vector.load %arg9[%c1, %c0_5] : memref<18x128xf32, #tpu.memory_space<vmem>>, vector<16x128xf32>
    tpu.vector_store %arg9[%c1, %c0_5], %4 {strides = array<i32>} : memref<18x128xf32, #tpu.memory_space<vmem>>, vector<16x128xf32>,
    %c0_6 = arith.constant 0 : index
    %c0_7 = arith.constant 0 : index
    %6 = vector.load %arg9[%c0_6, %c0_7] : memref<18x128xf32, #tpu.memory_space<vmem>>, vector<16x128xf32>
    %c0_8 = arith.constant 0 : index
    %c0_9 = arith.constant 0 : index
    %c0_10 = arith.constant 0 : index
    %7 = vector.load %arg2[%c0_8, %c0_9, %c0_10] : memref<3x128x128xf32, #tpu.memory_space<vmem>>, vector<1x128x128xf32>
    %8 = vector.shape_cast %7 : vector<1x128x128xf32> to vector<128x128xf32>
    %cst_11 = arith.constant dense<0.000000e+00> : vector<16x128xf32>
    %9 = tpu.matmul %6, %8, %cst_11 {dimension_numbers = #tpu.dot_dimension_numbers<[1], [0], [0], [1], [0, 0, 1, 1], [], []>} : vector<16x128xf32>, vector<128x128xf32>, vector<16x128xf32> -> vector<16x128xf32>
    %c0_12 = arith.constant 0 : index
    %c0_13 = arith.constant 0 : index
    %10 = vector.load %arg3[%c0_12, %c0_13] : memref<1x128xf32, #tpu.memory_space<vmem>>, vector<1x128xf32>
    %11 = vector.broadcast %10 : vector<1x128xf32> to vector<16x128xf32>
    %12 = arith.addf %9, %11 : vector<16x128xf32>
    %c1_14 = arith.constant 1 : index
    %c0_15 = arith.constant 0 : index
    %13 = vector.load %arg9[%c1_14, %c0_15] : memref<18x128xf32, #tpu.memory_space<vmem>>, vector<16x128xf32>
    %c1_16 = arith.constant 1 : index
    %c0_17 = arith.constant 0 : index
    %c0_18 = arith.constant 0 : index
    %14 = vector.load %arg2[%c1_16, %c0_17, %c0_18] : memref<3x128x128xf32, #tpu.memory_space<vmem>>, vector<1x128x128xf32>
    %15 = vector.shape_cast %14 : vector<1x128x128xf32> to vector<128x128xf32>
    %cst_19 = arith.constant dense<0.000000e+00> : vector<16x128xf32>
    %16 = tpu.matmul %13, %15, %cst_19 {dimension_numbers = #tpu.dot_dimension_numbers<[1], [0], [0], [1], [0, 0, 1, 1], [], []>} : vector<16x128xf32>, vector<128x128xf32>, vector<16x128xf32> -> vector<16x128xf32>
    %17 = arith.addf %12, %16 : vector<16x128xf32>
    %c2 = arith.constant 2 : index
    %c0_20 = arith.constant 0 : index
    %18 = vector.load %arg9[%c2, %c0_20] : memref<18x128xf32, #tpu.memory_space<vmem>>, vector<16x128xf32>
    %c2_21 = arith.constant 2 : index
    %c0_22 = arith.constant 0 : index
    %c0_23 = arith.constant 0 : index
    %19 = vector.load %arg2[%c2_21, %c0_22, %c0_23] : memref<3x128x128xf32, #tpu.memory_space<vmem>>, vector<1x128x128xf32>
    %20 = vector.shape_cast %19 : vector<1x128x128xf32> to vector<128x128xf32>
    %cst_24 = arith.constant dense<0.000000e+00> : vector<16x128xf32>
    %21 = tpu.matmul %18, %20, %cst_24 {dimension_numbers = #tpu.dot_dimension_numbers<[1], [0], [0], [1], [0, 0, 1, 1], [], []>} : vector<16x128xf32>, vector<128x128xf32>, vector<16x128xf32> -> vector<16x128xf32>
    %22 = arith.addf %17, %21 : vector<16x128xf32>
    %cst_25 = arith.constant 2.000000e+01 : f32
    %23 = vector.broadcast %cst_25 : f32 to vector<16x128xf32>
    %24 = arith.minimumf %22, %23 : vector<16x128xf32>
    %25 = math.exp %24 : vector<16x128xf32>
    %cst_26 = arith.constant 2.000000e+00 : f32
    %26 = vector.broadcast %cst_26 : f32 to vector<16x128xf32>
    %27 = arith.addf %25, %26 : vector<16x128xf32>
    %28 = arith.mulf %25, %27 : vector<16x128xf32>
    %cst_27 = arith.constant 2.000000e+00 : f32
    %29 = vector.broadcast %cst_27 : f32 to vector<16x128xf32>
    %30 = arith.addf %28, %29 : vector<16x128xf32>
    %31 = arith.divf %28, %30 : vector<16x128xf32>
    %32 = arith.mulf %22, %31 : vector<16x128xf32>
    %c1_28 = arith.constant 1 : index
    %c0_29 = arith.constant 0 : index
    %33 = vector.load %arg9[%c1_28, %c0_29] : memref<18x128xf32, #tpu.memory_space<vmem>>, vector<16x128xf32>
    tpu.vector_store %arg9[%c1_28, %c0_29], %32 {strides = array<i32>} : memref<18x128xf32, #tpu.memory_space<vmem>>, vector<16x128xf32>,
    %c0_30 = arith.constant 0 : index
    %c0_31 = arith.constant 0 : index
    %34 = vector.load %arg9[%c0_30, %c0_31] : memref<18x128xf32, #tpu.memory_space<vmem>>, vector<16x128xf32>
    %c0_32 = arith.constant 0 : index
    %c0_33 = arith.constant 0 : index
    %c0_34 = arith.constant 0 : index
    %35 = vector.load %arg4[%c0_32, %c0_33, %c0_34] : memref<3x128x128xf32, #tpu.memory_space<vmem>>, vector<1x128x128xf32>
    %36 = vector.shape_cast %35 : vector<1x128x128xf32> to vector<128x128xf32>
    %cst_35 = arith.constant dense<0.000000e+00> : vector<16x128xf32>
    %37 = tpu.matmul %34, %36, %cst_35 {dimension_numbers = #tpu.dot_dimension_numbers<[1], [0], [0], [1], [0, 0, 1, 1], [], []>} : vector<16x128xf32>, vector<128x128xf32>, vector<16x128xf32> -> vector<16x128xf32>
    %c0_36 = arith.constant 0 : index
    %c0_37 = arith.constant 0 : index
    %38 = vector.load %arg5[%c0_36, %c0_37] : memref<1x128xf32, #tpu.memory_space<vmem>>, vector<1x128xf32>
    %39 = vector.broadcast %38 : vector<1x128xf32> to vector<16x128xf32>
    %40 = arith.addf %37, %39 : vector<16x128xf32>
    %c1_38 = arith.constant 1 : index
    %c0_39 = arith.constant 0 : index
    %41 = vector.load %arg9[%c1_38, %c0_39] : memref<18x128xf32, #tpu.memory_space<vmem>>, vector<16x128xf32>
    %c1_40 = arith.constant 1 : index
    %c0_41 = arith.constant 0 : index
    %c0_42 = arith.constant 0 : index
    %42 = vector.load %arg4[%c1_40, %c0_41, %c0_42] : memref<3x128x128xf32, #tpu.memory_space<vmem>>, vector<1x128x128xf32>
    %43 = vector.shape_cast %42 : vector<1x128x128xf32> to vector<128x128xf32>
    %cst_43 = arith.constant dense<0.000000e+00> : vector<16x128xf32>
    %44 = tpu.matmul %41, %43, %cst_43 {dimension_numbers = #tpu.dot_dimension_numbers<[1], [0], [0], [1], [0, 0, 1, 1], [], []>} : vector<16x128xf32>, vector<128x128xf32>, vector<16x128xf32> -> vector<16x128xf32>
    %45 = arith.addf %40, %44 : vector<16x128xf32>
    %c2_44 = arith.constant 2 : index
    %c0_45 = arith.constant 0 : index
    %46 = vector.load %arg9[%c2_44, %c0_45] : memref<18x128xf32, #tpu.memory_space<vmem>>, vector<16x128xf32>
    %c2_46 = arith.constant 2 : index
    %c0_47 = arith.constant 0 : index
    %c0_48 = arith.constant 0 : index
    %47 = vector.load %arg4[%c2_46, %c0_47, %c0_48] : memref<3x128x128xf32, #tpu.memory_space<vmem>>, vector<1x128x128xf32>
    %48 = vector.shape_cast %47 : vector<1x128x128xf32> to vector<128x128xf32>
    %cst_49 = arith.constant dense<0.000000e+00> : vector<16x128xf32>
    %49 = tpu.matmul %46, %48, %cst_49 {dimension_numbers = #tpu.dot_dimension_numbers<[1], [0], [0], [1], [0, 0, 1, 1], [], []>} : vector<16x128xf32>, vector<128x128xf32>, vector<16x128xf32> -> vector<16x128xf32>
    %50 = arith.addf %45, %49 : vector<16x128xf32>
    %cst_50 = arith.constant 2.000000e+01 : f32
    %51 = vector.broadcast %cst_50 : f32 to vector<16x128xf32>
    %52 = arith.minimumf %50, %51 : vector<16x128xf32>
    %53 = math.exp %52 : vector<16x128xf32>
    %cst_51 = arith.constant 2.000000e+00 : f32
    %54 = vector.broadcast %cst_51 : f32 to vector<16x128xf32>
    %55 = arith.addf %53, %54 : vector<16x128xf32>
    %56 = arith.mulf %53, %55 : vector<16x128xf32>
    %cst_52 = arith.constant 2.000000e+00 : f32
    %57 = vector.broadcast %cst_52 : f32 to vector<16x128xf32>
    %58 = arith.addf %56, %57 : vector<16x128xf32>
    %59 = arith.divf %56, %58 : vector<16x128xf32>
    %60 = arith.mulf %50, %59 : vector<16x128xf32>
    %c1_53 = arith.constant 1 : index
    %c0_54 = arith.constant 0 : index
    %61 = vector.load %arg9[%c1_53, %c0_54] : memref<18x128xf32, #tpu.memory_space<vmem>>, vector<16x128xf32>
    tpu.vector_store %arg9[%c1_53, %c0_54], %60 {strides = array<i32>} : memref<18x128xf32, #tpu.memory_space<vmem>>, vector<16x128xf32>,
    %c0_55 = arith.constant 0 : index
    %c0_56 = arith.constant 0 : index
    %62 = vector.load %arg9[%c0_55, %c0_56] : memref<18x128xf32, #tpu.memory_space<vmem>>, vector<16x128xf32>
    %c0_57 = arith.constant 0 : index
    %c0_58 = arith.constant 0 : index
    %c0_59 = arith.constant 0 : index
    %63 = vector.load %arg6[%c0_57, %c0_58, %c0_59] : memref<3x128x128xf32, #tpu.memory_space<vmem>>, vector<1x128x128xf32>
    %64 = vector.shape_cast %63 : vector<1x128x128xf32> to vector<128x128xf32>
    %cst_60 = arith.constant dense<0.000000e+00> : vector<16x128xf32>
    %65 = tpu.matmul %62, %64, %cst_60 {dimension_numbers = #tpu.dot_dimension_numbers<[1], [0], [0], [1], [0, 0, 1, 1], [], []>} : vector<16x128xf32>, vector<128x128xf32>, vector<16x128xf32> -> vector<16x128xf32>
    %c0_61 = arith.constant 0 : index
    %c0_62 = arith.constant 0 : index
    %66 = vector.load %arg7[%c0_61, %c0_62] : memref<1x128xf32, #tpu.memory_space<vmem>>, vector<1x128xf32>
    %67 = vector.broadcast %66 : vector<1x128xf32> to vector<16x128xf32>
    %68 = arith.addf %65, %67 : vector<16x128xf32>
    %c1_63 = arith.constant 1 : index
    %c0_64 = arith.constant 0 : index
    %69 = vector.load %arg9[%c1_63, %c0_64] : memref<18x128xf32, #tpu.memory_space<vmem>>, vector<16x128xf32>
    %c1_65 = arith.constant 1 : index
    %c0_66 = arith.constant 0 : index
    %c0_67 = arith.constant 0 : index
    %70 = vector.load %arg6[%c1_65, %c0_66, %c0_67] : memref<3x128x128xf32, #tpu.memory_space<vmem>>, vector<1x128x128xf32>
    %71 = vector.shape_cast %70 : vector<1x128x128xf32> to vector<128x128xf32>
    %cst_68 = arith.constant dense<0.000000e+00> : vector<16x128xf32>
    %72 = tpu.matmul %69, %71, %cst_68 {dimension_numbers = #tpu.dot_dimension_numbers<[1], [0], [0], [1], [0, 0, 1, 1], [], []>} : vector<16x128xf32>, vector<128x128xf32>, vector<16x128xf32> -> vector<16x128xf32>
    %73 = arith.addf %68, %72 : vector<16x128xf32>
    %c2_69 = arith.constant 2 : index
    %c0_70 = arith.constant 0 : index
    %74 = vector.load %arg9[%c2_69, %c0_70] : memref<18x128xf32, #tpu.memory_space<vmem>>, vector<16x128xf32>
    %c2_71 = arith.constant 2 : index
    %c0_72 = arith.constant 0 : index
    %c0_73 = arith.constant 0 : index
    %75 = vector.load %arg6[%c2_71, %c0_72, %c0_73] : memref<3x128x128xf32, #tpu.memory_space<vmem>>, vector<1x128x128xf32>
    %76 = vector.shape_cast %75 : vector<1x128x128xf32> to vector<128x128xf32>
    %cst_74 = arith.constant dense<0.000000e+00> : vector<16x128xf32>
    %77 = tpu.matmul %74, %76, %cst_74 {dimension_numbers = #tpu.dot_dimension_numbers<[1], [0], [0], [1], [0, 0, 1, 1], [], []>} : vector<16x128xf32>, vector<128x128xf32>, vector<16x128xf32> -> vector<16x128xf32>
    %78 = arith.addf %73, %77 : vector<16x128xf32>
    %79 = arith.negf %78 : vector<16x128xf32>
    %80 = math.exp %79 : vector<16x128xf32>
    %cst_75 = arith.constant 1.000000e+00 : f32
    %81 = vector.broadcast %cst_75 : f32 to vector<16x128xf32>
    %82 = arith.addf %81, %80 : vector<16x128xf32>
    %83 = arith.divf %81, %82 : vector<16x128xf32>
    %cst_76 = arith.constant 5.000000e-01 : f32
    %84 = vector.broadcast %cst_76 : f32 to vector<16x128xf32>
    %85 = arith.subf %83, %84 : vector<16x128xf32>
    %86 = arith.addf %78, %4 : vector<16x128xf32>
    %87 = arith.mulf %86, %85 : vector<16x128xf32>
    %c0_77 = arith.constant 0 : index
    %c0_78 = arith.constant 0 : index
    %c0_79 = arith.constant 0 : index
    %88 = vector.load %arg8[%c0_77, %c0_78, %c0_79] : memref<1x16x128xf32, #tpu.memory_space<vmem>>, vector<1x16x128xf32>
    %89 = vector.shape_cast %88 : vector<1x16x128xf32> to vector<16x128xf32>
    %90 = vector.shape_cast %87 : vector<16x128xf32> to vector<1x16x128xf32>
    tpu.vector_store %arg8[%c0_77, %c0_78, %c0_79], %90 {strides = array<i32>} : memref<1x16x128xf32, #tpu.memory_space<vmem>>, vector<1x16x128xf32>,
    return
  }
  func.func @transform_0(%arg0: i32) -> (i32, i32, i32) {
    %c0_i32 = arith.constant 0 : i32
    %c0_i32_0 = arith.constant 0 : i32
    %c0_i32_1 = arith.constant 0 : i32
    return %arg0, %c0_i32, %c0_i32_0 : i32, i32, i32
  }
  func.func @transform_1(%arg0: i32) -> (i32, i32, i32) {
    %c0_i32 = arith.constant 0 : i32
    %c0_i32_0 = arith.constant 0 : i32
    %c0_i32_1 = arith.constant 0 : i32
    %c0_i32_2 = arith.constant 0 : i32
    return %c0_i32, %c0_i32_0, %c0_i32_1 : i32, i32, i32
  }
  func.func @transform_2(%arg0: i32) -> (i32, i32) {
    %c0_i32 = arith.constant 0 : i32
    %c0_i32_0 = arith.constant 0 : i32
    %c0_i32_1 = arith.constant 0 : i32
    return %c0_i32, %c0_i32_0 : i32, i32
  }
  func.func @transform_3(%arg0: i32) -> (i32, i32, i32) {
    %c0_i32 = arith.constant 0 : i32
    %c0_i32_0 = arith.constant 0 : i32
    %c0_i32_1 = arith.constant 0 : i32
    %c0_i32_2 = arith.constant 0 : i32
    return %c0_i32, %c0_i32_0, %c0_i32_1 : i32, i32, i32
  }
  func.func @transform_4(%arg0: i32) -> (i32, i32) {
    %c0_i32 = arith.constant 0 : i32
    %c0_i32_0 = arith.constant 0 : i32
    %c0_i32_1 = arith.constant 0 : i32
    return %c0_i32, %c0_i32_0 : i32, i32
  }
  func.func @transform_5(%arg0: i32) -> (i32, i32, i32) {
    %c0_i32 = arith.constant 0 : i32
    %c0_i32_0 = arith.constant 0 : i32
    %c0_i32_1 = arith.constant 0 : i32
    %c0_i32_2 = arith.constant 0 : i32
    return %c0_i32, %c0_i32_0, %c0_i32_1 : i32, i32, i32
  }
  func.func @transform_6(%arg0: i32) -> (i32, i32) {
    %c0_i32 = arith.constant 0 : i32
    %c0_i32_0 = arith.constant 0 : i32
    %c0_i32_1 = arith.constant 0 : i32
    return %c0_i32, %c0_i32_0 : i32, i32
  }
  func.func @transform_7(%arg0: i32) -> (i32, i32, i32) {
    %c0_i32 = arith.constant 0 : i32
    %c0_i32_0 = arith.constant 0 : i32
    %c0_i32_1 = arith.constant 0 : i32
    return %arg0, %c0_i32, %c0_i32_0 : i32, i32, i32
  }
}

</mosaic_0001>

<bundles_post_ra>
// kernel: tile.18
= control target key start
LH: loop header
LB: loop body
LE: loop exit
PB: predicated region body
PF: predicated region fallthrough
CT: control target
= control target key end

     0   :  { %s28_s0 = inlined_call_operand.vmem [shape: f32[8], index: 0, kind: input, shape index: {}]   ;;  %s29_s1 = inlined_call_operand.vmem [shape: f32[16,8], index: 1, kind: output, shape index: {}]  }
   0x1   :  { %v4_v0 = vld [vmem:[%s28_s0] ss:$0 sm:$0xff] }
   0x2   :  { %5 = vst [vmem:[%s29_s1] sm:$0xff] %v4_v0  ;;  %8 = vst [vmem:[%s29_s1 + $0x8] sm:$0xff] %v4_v0 }

// kernel: tile.19
= control target key start
LH: loop header
LB: loop body
LE: loop exit
PB: predicated region body
PF: predicated region fallthrough
CT: control target
= control target key end

     0   :  { %s131_s10 = smov 120   ;;  %s132_s11 = smov 104   ;;  %vm3_vm0 = vcmask 64512   ;;  %vm9_vm1 = vcmask 1048512   ;;  %vm15_vm2 = vcmask 982912   ;;  %vm21_vm3 = vcmask 917312   ;;  %s207_s0 = inlined_call_operand.vmem [shape: f32[16,8], index: 0, kind: input, shape index: {}]   ;;  %s208_s1 = inlined_call_operand.vmem [shape: f32[1,128], index: 1, kind: output, shape index: {}]  }
   0x1   :  { %v101_v0 = vld [vmem:[%s207_s0 + $0xf] sm:$0x1]   ;;  %v103_v1 = vld [vmem:[%s207_s0 + $0xd] sm:$0x1]   ;;  %v102_v2 = vld [vmem:[%s207_s0 + $0xe] sm:$0x1]  }
   0x2   :  { %7 = vrot.lane.b32.xlu0 %v101_v0, %s131_s10  ;;  %19 = vrot.lane.b32.xlu1 %v103_v1, %s132_s11  ;;  %v104_v3 = vld [vmem:[%s207_s0 + $0xc] sm:$0x1]   ;;  %s133_s16 = smov 112   ;;  %s134_s17 = smov 96   ;;  %v105_v4 = vld [vmem:[%s207_s0 + $0xb] sm:$0x1]  }
   0x3   :  { %v106_v5 = vld [vmem:[%s207_s0 + $0xa] sm:$0x1]   ;;  %v2_v6 = vld [vmem:[%s207_s0] sm:$0x1]   ;;  %s135_s24 = smov 88   ;;  %s136_s25 = smov 80  }
   0x4   :  { %4 = vst.msk [vmem:[#allocation0] sm:$0x1] %vm3_vm0, %v2_v6   ;;  %v107_v7 = vld [vmem:[%s207_s0 + $0x9] sm:$0x1]   ;;  %v108_v8 = vld [vmem:[%s207_s0 + $0x8] sm:$0x1]  }
   0x5   :  { %s137_s30 = smov 72   ;;  %s138_s2 = smov 64   ;;  %v109_v9 = vld [vmem:[%s207_s0 + $0x7] sm:$0x1]   ;;  %v110_v10 = vld [vmem:[%s207_s0 + $0x6] sm:$0x1]  }
   0x6   :  { %13 = vrot.lane.b32.xlu0 %v102_v2, %s133_s16  ;;  %25 = vrot.lane.b32.xlu1 %v104_v3, %s134_s17  ;;  %s139_s7 = smov 56   ;;  %s140_s8 = smov 48   ;;  %v111_v11 = vld [vmem:[%s207_s0 + $0x5] sm:$0x1]   ;;  %v112_v12 = vld [vmem:[%s207_s0 + $0x4] sm:$0x1]  }
   0x7   :  { %s141_s13 = smov 40   ;;  %s142_s14 = smov 32   ;;  %v113_v13 = vld [vmem:[%s207_s0 + $0x3] sm:$0x1]   ;;  %v114_v14 = vld [vmem:[%s207_s0 + $0x2] sm:$0x1]  }
   0x8   :  { %s143_s19 = smov 24   ;;  %s144_s20 = smov 16   ;;  %v115_v15 = vld [vmem:[%s207_s0 + $0x1] sm:$0x1]   ;;  %vm27_vm4 = vcmask 851712   ;;  %vm33_vm5 = vcmask 786112  }
   0x9   :  { %s145_s0 = smov 8   ;;  %vm39_vm6 = vcmask 720512   ;;  %vm45_vm7 = vcmask 654912   ;;  %vm51_vm8 = vcmask 589312   ;;  %vm57_vm9 = vcmask 523712  }
   0xa   :  { %31 = vrot.lane.b32.xlu0 %v105_v4, %s135_s24  ;;  %37 = vrot.lane.b32.xlu1 %v106_v5, %s136_s25  ;;  %vm63_vm10 = vcmask 458112   ;;  %vm69_vm11 = vcmask 392512   ;;  %vm75_vm12 = vcmask 326912   ;;  %vm81_vm13 = vcmask 261312  }
   0xb   :  { %vm87_vm14 = vcmask 195712   ;;  %vm93_vm15 = vcmask 130112  }
   0xe   :  { %43 = vrot.lane.b32.xlu0 %v107_v7, %s137_s30  ;;  %49 = vrot.lane.b32.xlu1 %v108_v8, %s138_s2 }
  0x12   :  { %55 = vrot.lane.b32.xlu0 %v109_v9, %s139_s7  ;;  %61 = vrot.lane.b32.xlu1 %v110_v10, %s140_s8 }
  0x16   :  { %67 = vrot.lane.b32.xlu0 %v111_v11, %s141_s13  ;;  %73 = vrot.lane.b32.xlu1 %v112_v12, %s142_s14 }
  0x1a   :  { %79 = vrot.lane.b32.xlu0 %v113_v13, %s143_s19  ;;  %85 = vrot.lane.b32.xlu1 %v114_v14, %s144_s20 }
  0x1e   :  { %91 = vrot.lane.b32.xlu0 %v115_v15, %s145_s0 }
  0x74   :  { %v8_v16 = vpop.permute.xlu0 %7   ;;  %v20_v17 = vpop.permute.xlu1 %19  }
  0x75   :  { %10 = vst.msk [vmem:[#allocation0] sm:$0x1] %vm9_vm1, %v8_v16  }
  0x78   :  { %v14_v18 = vpop.permute.xlu0 %13   ;;  %v26_v19 = vpop.permute.xlu1 %25  }
  0x79   :  { %16 = vst.msk [vmem:[#allocation0] sm:$0x1] %vm15_vm2, %v14_v18  }
  0x7a   :  { %22 = vst.msk [vmem:[#allocation0] sm:$0x1] %vm21_vm3, %v20_v17  }
  0x7b   :  { %28 = vst.msk [vmem:[#allocation0] sm:$0x1] %vm27_vm4, %v26_v19  }
  0x7c   :  { %v32_v20 = vpop.permute.xlu0 %31   ;;  %v38_v21 = vpop.permute.xlu1 %37  }
  0x7d   :  { %34 = vst.msk [vmem:[#allocation0] sm:$0x1] %vm33_vm5, %v32_v20  }
  0x7e   :  { %40 = vst.msk [vmem:[#allocation0] sm:$0x1] %vm39_vm6, %v38_v21  }
  0x80   :  { %v44_v22 = vpop.permute.xlu0 %43   ;;  %v50_v23 = vpop.permute.xlu1 %49  }
  0x81   :  { %46 = vst.msk [vmem:[#allocation0] sm:$0x1] %vm45_vm7, %v44_v22  }
  0x82   :  { %52 = vst.msk [vmem:[#allocation0] sm:$0x1] %vm51_vm8, %v50_v23  }
  0x84   :  { %v56_v24 = vpop.permute.xlu0 %55   ;;  %v62_v25 = vpop.permute.xlu1 %61  }
  0x85   :  { %58 = vst.msk [vmem:[#allocation0] sm:$0x1] %vm57_vm9, %v56_v24  }
  0x86   :  { %64 = vst.msk [vmem:[#allocation0] sm:$0x1] %vm63_vm10, %v62_v25  }
  0x88   :  { %v68_v26 = vpop.permute.xlu0 %67   ;;  %v74_v27 = vpop.permute.xlu1 %73  }
  0x89   :  { %70 = vst.msk [vmem:[#allocation0] sm:$0x1] %vm69_vm11, %v68_v26  }
  0x8a   :  { %76 = vst.msk [vmem:[#allocation0] sm:$0x1] %vm75_vm12, %v74_v27  }
  0x8c   :  { %v80_v28 = vpop.permute.xlu0 %79   ;;  %v86_v29 = vpop.permute.xlu1 %85  }
  0x8d   :  { %82 = vst.msk [vmem:[#allocation0] sm:$0x1] %vm81_vm13, %v80_v28  }
  0x8e   :  { %88 = vst.msk [vmem:[#allocation0] sm:$0x1] %vm87_vm14, %v86_v29  }
  0x90   :  { %v92_v30 = vpop.permute.xlu0 %91  }
  0x91   :  { %94 = vst.msk [vmem:[#allocation0] sm:$0x1] %vm93_vm15, %v92_v30  }
  0x98   :  { %v98_v31 = vld [vmem:[#allocation0] sm:$0x1] }
  0x99   :  { %100 = vst [vmem:[%s208_s1] sm:$0x1] %v98_v31 }

// kernel: spab_forward.1
= control target key start
LH: loop header
LB: loop body
LE: loop exit
PB: predicated region body
PF: predicated region fallthrough
CT: control target
= control target key end

     0   :  { %s2257_s24 = smov 0   ;;  %s2732_s0 = inlined_call_operand.vmem [shape: f32[2,16,128], index: 0, kind: input, shape index: {}]   ;;  %s2733_s1 = inlined_call_operand.vmem [shape: f32[3,128,128], index: 1, kind: input, shape index: {}]   ;;  %s2734_s2 = inlined_call_operand.vmem [shape: f32[1,128], index: 2, kind: input, shape index: {}]   ;;  %s2735_s3 = inlined_call_operand.vmem [shape: f32[3,128,128], index: 3, kind: input, shape index: {}]   ;;  %s2736_s4 = inlined_call_operand.vmem [shape: f32[1,128], index: 4, kind: input, shape index: {}]   ;;  %s2737_s5 = inlined_call_operand.vmem [shape: f32[3,128,128], index: 5, kind: input, shape index: {}]   ;;  %s2738_s6 = inlined_call_operand.vmem [shape: f32[1,128], index: 6, kind: input, shape index: {}]   ;;  %s2739_s7 = inlined_call_operand.vmem [shape: f32[2,16,128], index: 7, kind: output, shape index: {}]  }
   0x1 LB: > { %s1276_s25 = sadd.s32 4294967295, %s2214_s24   ;;  %p1280_p0 = scmp.ge.s32.totalorder %s2214_s24, 1  ;;  %s2214_s24 = sphi %s2257_s24, %s17_s24  }
   0x2   : > { %p237_p1 = scmp.lt.s32.totalorder %s2214_s24, 3 }
   0x4   : > { %p238_p2 = pnand %p1280_p0, %p237_p1 }
   0x5   : > { %v1286_v0 = vld [vmem:[%s2733_s1 + $0x80] sm:$0xff] (!%p238_p2)  ;;  %v1287_v1 = vld [vmem:[%s2733_s1 + $0x88] sm:$0xff] (!%p238_p2)  ;;  %v1288_v2 = vld [vmem:[%s2733_s1 + $0x90] sm:$0xff] (!%p238_p2)  ;;  %p269_p3 = scmp.lt.s32.totalorder (!%p238_p2), %s1276_s25, 1  ;;  %v2216_v5 = vmov (!%p238_p2), 0.0  }
   0x6   : > { %241 = sbr.rel (%p238_p2) target bundleno = 966 (0x3c6), region = 48  ;;  %v1901_v3 = vpack.c.bf16 (!%p238_p2), %v1287_v1, %v1286_v0  ;;  %v1289_v4 = vld [vmem:[%s2733_s1 + $0x98] sm:$0xff] (!%p238_p2)  ;;  %279 = vst [vmem:[#allocation2] sm:$0x1] (!%p238_p2), %v2216_v5  ;;  %280 = vst [vmem:[#allocation2 + $0x11] sm:$0x1] (!%p238_p2), %v2216_v5 }
   0x7   : > { %v1905_v6 = vpack.c.bf16 (!%p238_p2), %v1289_v4, %v1288_v2  ;;  %v1290_v7 = vld [vmem:[%s2733_s1 + $0xa0] sm:$0xff] (!%p238_p2)  ;;  %v1291_v8 = vld [vmem:[%s2733_s1 + $0xa8] sm:$0xff] (!%p238_p2)  ;;  %v1292_v12 = vld [vmem:[%s2733_s1 + $0xb0] sm:$0xff] (!%p238_p2) }
   0x8   : > { %1902 = vmatprep.subr.bf16.mxu0 (!%p238_p2), %v1901_v3  ;;  %v1909_v9 = vpack.c.bf16 (!%p238_p2), %v1291_v8, %v1290_v7  ;;  %v287_v10 = vld [vmem:[%s2733_s1] sm:$0xff] (!%p238_p2)  ;;  %v288_v11 = vld [vmem:[%s2733_s1 + $0x8] sm:$0xff] (!%p238_p2)  ;;  %v1293_v13 = vld [vmem:[%s2733_s1 + $0xb8] sm:$0xff] (!%p238_p2) }
   0x9   : > { %1904 = vmatpush3.bf16.msra.mxu0 (!%p238_p2), %v1901_v3  ;;  %v1869_v14 = vpack.c.bf16 (!%p238_p2), %v288_v11, %v287_v10  ;;  %v289_v16 = vld [vmem:[%s2733_s1 + $0x10] sm:$0xff] (!%p238_p2)  ;;  %v290_v17 = vld [vmem:[%s2733_s1 + $0x18] sm:$0xff] (!%p238_p2)  ;;  %v291_v20 = vld [vmem:[%s2733_s1 + $0x20] sm:$0xff] (!%p238_p2)  ;;  %v1913_v21 = vpack.c.bf16 (!%p238_p2), %v1293_v13, %v1292_v12 }
   0xa   : > { %1906 = vmatprep.subr.bf16.mxu0 (!%p238_p2), %v1905_v6  ;;  %v1873_v19 = vpack.c.bf16 (!%p238_p2), %v290_v17, %v289_v16  ;;  %v292_v22 = vld [vmem:[%s2733_s1 + $0x28] sm:$0xff] (!%p238_p2)  ;;  %v1294_v23 = vld [vmem:[%s2733_s1 + $0xc0] sm:$0xff] (!%p238_p2)  ;;  %v293_v26 = vld [vmem:[%s2733_s1 + $0x30] sm:$0xff] (!%p238_p2) }
   0xb   : > { %1870 = vmatprep.subr.bf16.mxu1 (!%p238_p2), %v1869_v14  ;;  %v1295_v24 = vld [vmem:[%s2733_s1 + $0xc8] sm:$0xff] (!%p238_p2)  ;;  %v1877_v25 = vpack.c.bf16 (!%p238_p2), %v292_v22, %v291_v20  ;;  %v294_v27 = vld [vmem:[%s2733_s1 + $0x38] sm:$0xff] (!%p238_p2)  ;;  %v1296_v29 = vld [vmem:[%s2733_s1 + $0xd0] sm:$0xff] (!%p238_p2) }
   0xc   : > { %1872 = vmatpush3.bf16.msra.mxu1 (!%p238_p2), %v1869_v14  ;;  %v1917_v28 = vpack.c.bf16 (!%p238_p2), %v1295_v24, %v1294_v23  ;;  %v1297_v30 = vld [vmem:[%s2733_s1 + $0xd8] sm:$0xff] (!%p238_p2)  ;;  %v1881_v31 = vpack.c.bf16 (!%p238_p2), %v294_v27, %v293_v26  ;;  %v295_v32 = vld [vmem:[%s2733_s1 + $0x40] sm:$0xff] (!%p238_p2)  ;;  %v296_v33 = vld [vmem:[%s2733_s1 + $0x48] sm:$0xff] (!%p238_p2) }
   0xd   : > { %s2741_s25 = smov (!%p269_p3, %s1276_s25), 1  ;;  %1908 = vmatpush3.bf16.msra.mxu0 %v1905_v6  ;;  %1874 = vmatprep.subr.bf16.mxu1 %v1873_v19  ;;  %v1921_v35 = vpack.c.bf16 %v1297_v30, %v1296_v29  ;;  %v1298_v36 = vld [vmem:[%s2733_s1 + $0xe0] sm:$0xff]  ;;  %v1299_v37 = vld [vmem:[%s2733_s1 + $0xe8] sm:$0xff]  ;;  %v1885_v38 = vpack.c.bf16 %v296_v33, %v295_v32  ;;  %v297_v39 = vld [vmem:[%s2733_s1 + $0x50] sm:$0xff] }
   0xe   : > { %s1390_s15 = sshll.u32 %s2741_s25, 4  ;;  %1910 = vmatprep.subr.bf16.mxu0 %v1909_v9  ;;  %v298_v40 = vld [vmem:[%s2733_s1 + $0x58] sm:$0xff]  ;;  %v1925_v41 = vpack.c.bf16 %v1299_v37, %v1298_v36  ;;  %v1300_v42 = vld [vmem:[%s2733_s1 + $0xf0] sm:$0xff]  ;;  %v299_v45 = vld [vmem:[%s2733_s1 + $0x60] sm:$0xff] }
   0xf   : > { %s273_s22 = scalar_lea.vmem %s2732_s0, %s1390_s15  ;;  %v1301_v43 = vld [vmem:[%s2733_s1 + $0xf8] sm:$0xff]  ;;  %v1889_v44 = vpack.c.bf16 %v298_v40, %v297_v39  ;;  %v300_v46 = vld [vmem:[%s2733_s1 + $0x68] sm:$0xff]  ;;  %v1302_v48 = vld [vmem:[%s2733_s1 + $0x100] sm:$0xff]  ;;  %s278_s23 = scalar_lea.vmem %s2739_s7, %s1390_s15 }
  0x10   : > { %v2303_v15 = vld [vmem:[%s273_s22] sm:$0xff]  ;;  %v2313_v18 = vld [vmem:[%s273_s22 + $0x8] sm:$0xff]  ;;  %1876 = vmatpush3.bf16.msra.mxu1 %v1873_v19  ;;  %v1929_v47 = vpack.c.bf16 %v1301_v43, %v1300_v42  ;;  %v1893_v50 = vpack.c.bf16 %v300_v46, %v299_v45  ;;  %v301_v51 = vld [vmem:[%s2733_s1 + $0x70] sm:$0xff] }
  0x11   : > { %283 = vst [vmem:[#allocation2 + $0x1] sm:$0xff] %v2303_v15  ;;  %1621 = vmatprep.mubr.f32.mxu0 %v2303_v15  ;;  %284 = vst [vmem:[#allocation2 + $0x9] sm:$0xff] %v2313_v18  ;;  %1912 = vmatpush3.bf16.msra.mxu0 %v1909_v9  ;;  %v1303_v49 = vld [vmem:[%s2733_s1 + $0x108] sm:$0xff]  ;;  %v302_v52 = vld [vmem:[%s2733_s1 + $0x78] sm:$0xff] }
  0x12   : > { %1914 = vmatprep.subr.bf16.mxu0 %v1913_v21  ;;  %1878 = vmatprep.subr.bf16.mxu1 %v1877_v25  ;;  %v1933_v53 = vpack.c.bf16 %v1303_v49, %v1302_v48  ;;  %v1304_v54 = vld [vmem:[%s2733_s1 + $0x110] sm:$0xff]  ;;  %v1305_v55 = vld [vmem:[%s2733_s1 + $0x118] sm:$0xff]  ;;  %v1897_v56 = vpack.c.bf16 %v302_v52, %v301_v51  ;;  %v1306_v59 = vld [vmem:[%s2733_s1 + $0x120] sm:$0xff] }
  0x13   : > { %v1937_v57 = vpack.c.bf16 %v1305_v55, %v1304_v54  ;;  %v1307_v60 = vld [vmem:[%s2733_s1 + $0x128] sm:$0xff]  ;;  %v1308_v63 = vld [vmem:[%s2733_s1 + $0x130] sm:$0xff]  ;;  %v1309_v0 = vld [vmem:[%s2733_s1 + $0x138] sm:$0xff] }
  0x14   : > { %1880 = vmatpush3.bf16.msra.mxu1 %v1877_v25  ;;  %v1941_v61 = vpack.c.bf16 %v1307_v60, %v1306_v59  ;;  %v1945_v1 = vpack.c.bf16 %v1309_v0, %v1308_v63  ;;  %v1310_v2 = vld [vmem:[%s2733_s1 + $0x140] sm:$0xff]  ;;  %v1311_v3 = vld [vmem:[%s2733_s1 + $0x148] sm:$0xff]  ;;  %v1312_v5 = vld [vmem:[%s2733_s1 + $0x150] sm:$0xff] }
  0x15   : > { %1916 = vmatpush3.bf16.msra.mxu0 %v1913_v21  ;;  %1882 = vmatprep.subr.bf16.mxu1 %v1881_v31  ;;  %v1949_v4 = vpack.c.bf16 %v1311_v3, %v1310_v2  ;;  %v1313_v6 = vld [vmem:[%s2733_s1 + $0x158] sm:$0xff]  ;;  %v1314_v8 = vld [vmem:[%s2733_s1 + $0x160] sm:$0xff]  ;;  %v1315_v9 = vld [vmem:[%s2733_s1 + $0x168] sm:$0xff] }
  0x16   : > { %1918 = vmatprep.subr.bf16.mxu0 %v1917_v28  ;;  %v1953_v7 = vpack.c.bf16 %v1313_v6, %v1312_v5  ;;  %v1957_v10 = vpack.c.bf16 %v1315_v9, %v1314_v8  ;;  %v1316_v11 = vld [vmem:[%s2733_s1 + $0x170] sm:$0xff]  ;;  %v1317_v12 = vld [vmem:[%s2733_s1 + $0x178] sm:$0xff]  ;;  %v599_v16 = vld [vmem:[%s2735_s3] sm:$0xff] }
  0x17   : > { %v1961_v13 = vpack.c.bf16 %v1317_v12, %v1316_v11  ;;  %v600_v17 = vld [vmem:[%s2735_s3 + $0x8] sm:$0xff]  ;;  %v601_v20 = vld [vmem:[%s2735_s3 + $0x10] sm:$0xff]  ;;  %v602_v21 = vld [vmem:[%s2735_s3 + $0x18] sm:$0xff] }
  0x18   : > { %v285_v34 = vld [vmem:[#allocation2] sm:$0xff]  ;;  %1884 = vmatpush3.bf16.msra.mxu1 %v1881_v31  ;;  %v286_v62 = vld [vmem:[#allocation2 + $0x8] sm:$0xff]  ;;  %v1965_v19 = vpack.c.bf16 %v600_v17, %v599_v16  ;;  %v1969_v22 = vpack.c.bf16 %v602_v21, %v601_v20  ;;  %v605_v26 = vld [vmem:[%s2735_s3 + $0x30] sm:$0xff] }
  0x19   : > { %1586 = vmatprep.mubr.f32.mxu1 %v285_v34  ;;  %1920 = vmatpush3.bf16.msra.mxu0 %v1917_v28  ;;  %v481_v58 = vld [vmem:[#allocation2 + $0x2] sm:$0xff]  ;;  %v482_v14 = vld [vmem:[#allocation2 + $0xa] sm:$0xff]  ;;  %v606_v27 = vld [vmem:[%s2735_s3 + $0x38] sm:$0xff] }
  0x1a   : > { %1922 = vmatprep.subr.bf16.mxu0 %v1921_v35  ;;  %1886 = vmatprep.subr.bf16.mxu1 %v1885_v38  ;;  %v603_v23 = vld [vmem:[%s2735_s3 + $0x20] sm:$0xff]  ;;  %v604_v24 = vld [vmem:[%s2735_s3 + $0x28] sm:$0xff]  ;;  %v1977_v28 = vpack.c.bf16 %v606_v27, %v605_v26  ;;  %v609_v32 = vld [vmem:[%s2735_s3 + $0x50] sm:$0xff] }
  0x1b   : > { %v1973_v25 = vpack.c.bf16 %v604_v24, %v603_v23  ;;  %v607_v29 = vld [vmem:[%s2735_s3 + $0x40] sm:$0xff]  ;;  %v608_v30 = vld [vmem:[%s2735_s3 + $0x48] sm:$0xff]  ;;  %v610_v33 = vld [vmem:[%s2735_s3 + $0x58] sm:$0xff] }
  0x1c   : > { %1888 = vmatpush3.bf16.msra.mxu1 %v1885_v38  ;;  %v1981_v31 = vpack.c.bf16 %v608_v30, %v607_v29  ;;  %v1985_v34 = vpack.c.bf16 %v610_v33, %v609_v32  ;;  %v612_v36 = vld [vmem:[%s2735_s3 + $0x68] sm:$0xff]  ;;  %v613_v38 = vld [vmem:[%s2735_s3 + $0x70] sm:$0xff]  ;;  %v614_v39 = vld [vmem:[%s2735_s3 + $0x78] sm:$0xff] }
  0x1d   : > { %1924 = vmatpush3.bf16.msra.mxu0 %v1921_v35  ;;  %1890 = vmatprep.subr.bf16.mxu1 %v1889_v44  ;;  %v611_v35 = vld [vmem:[%s2735_s3 + $0x60] sm:$0xff]  ;;  %v1993_v40 = vpack.c.bf16 %v614_v39, %v613_v38  ;;  %v1320_v42 = vld [vmem:[%s2735_s3 + $0x88] sm:$0xff]  ;;  %v1322_v8 = vld [vmem:[%s2735_s3 + $0x98] sm:$0xff] }
  0x1e   : > { %1926 = vmatprep.subr.bf16.mxu0 %v1925_v41  ;;  %v1989_v37 = vpack.c.bf16 %v612_v36, %v611_v35  ;;  %v1285_v46 = vld [vmem:[%s2734_s2] ss:$0 sm:$0xff]  ;;  %v1325_v16 = vld [vmem:[%s2735_s3 + $0xb0] sm:$0xff]  ;;  %v1326_v17 = vld [vmem:[%s2735_s3 + $0xb8] sm:$0xff] }
  0x1f   : > { %v1323_v12 = vld [vmem:[%s2735_s3 + $0xa0] sm:$0xff]  ;;  %v1328_v21 = vld [vmem:[%s2735_s3 + $0xc8] sm:$0xff]  ;;  %v1329_v23 = vld [vmem:[%s2735_s3 + $0xd0] sm:$0xff] }
  0x20   : > { %1892 = vmatpush3.bf16.msra.mxu1 %v1889_v44  ;;  %v1327_v20 = vld [vmem:[%s2735_s3 + $0xc0] sm:$0xff]  ;;  %v1330_v24 = vld [vmem:[%s2735_s3 + $0xd8] sm:$0xff]  ;;  %v1332_v27 = vld [vmem:[%s2735_s3 + $0xe8] sm:$0xff] }
  0x21   : > { %1928 = vmatpush3.bf16.msra.mxu0 %v1925_v41  ;;  %1894 = vmatprep.subr.bf16.mxu1 %v1893_v50  ;;  %v1319_v41 = vld [vmem:[%s2735_s3 + $0x80] sm:$0xff]  ;;  %v1333_v29 = vld [vmem:[%s2735_s3 + $0xf0] sm:$0xff]  ;;  %v1334_v30 = vld [vmem:[%s2735_s3 + $0xf8] sm:$0xff] }
  0x22   : > { %1930 = vmatprep.subr.bf16.mxu0 %v1929_v47  ;;  %v1997_v43 = vpack.c.bf16 %v1320_v42, %v1319_v41  ;;  %v1331_v26 = vld [vmem:[%s2735_s3 + $0xe0] sm:$0xff]  ;;  %v1336_v33 = vld [vmem:[%s2735_s3 + $0x108] sm:$0xff]  ;;  %v1337_v35 = vld [vmem:[%s2735_s3 + $0x110] sm:$0xff] }
  0x23   : > { %v1335_v32 = vld [vmem:[%s2735_s3 + $0x100] sm:$0xff]  ;;  %v1338_v36 = vld [vmem:[%s2735_s3 + $0x118] sm:$0xff]  ;;  %v1340_v39 = vld [vmem:[%s2735_s3 + $0x128] sm:$0xff] }
  0x24   : > { %1896 = vmatpush3.bf16.msra.mxu1 %v1893_v50  ;;  %v1339_v38 = vld [vmem:[%s2735_s3 + $0x120] sm:$0xff]  ;;  %v1341_v42 = vld [vmem:[%s2735_s3 + $0x130] sm:$0xff] }
  0x25   : > { %1932 = vmatpush3.bf16.msra.mxu0 %v1929_v47  ;;  %1898 = vmatprep.subr.bf16.mxu1 %v1897_v56  ;;  %v2037_v41 = vpack.c.bf16 %v1340_v39, %v1339_v38 }
  0x26   : > { %1934 = vmatprep.subr.bf16.mxu0 %v1933_v53 }
  0x28   : > { %1622 = vmatmul.mubr.f32.vlgmr.msra.gmra.mrb[0].mxu0 %v2313_v18  ;;  %1900 = vmatpush3.bf16.msra.mxu1 %v1897_v56 }
  0x29   : > { %1936 = vmatpush3.bf16.msra.mxu0 %v1933_v53  ;;  %1656 = vmatprep.mubr.f32.mxu0 %v481_v58 }
  0x2a   : > { %1938 = vmatprep.subr.bf16.mxu0 %v1937_v57  ;;  %1966 = vmatprep.subr.bf16.mxu1 %v1965_v19 }
  0x2b   : > { %1587 = vmatmul.mubr.f32.vlgmr.msra.gmra.mrb[0].mxu1 %v286_v62 }
  0x2c   : > { %1968 = vmatpush3.bf16.msra.mxu1 %v1965_v19  ;;  %v2009_v19 = vpack.c.bf16 %v1326_v17, %v1325_v16  ;;  %v925_v16 = vld [vmem:[%s2737_s5 + $0x70] sm:$0xff]  ;;  %v926_v17 = vld [vmem:[%s2737_s5 + $0x78] sm:$0xff] }
  0x2d   : > { %1940 = vmatpush3.bf16.msra.mxu0 %v1937_v57  ;;  %1970 = vmatprep.subr.bf16.mxu1 %v1969_v22 }
  0x2e   : > { %1942 = vmatprep.subr.bf16.mxu0 %v1941_v61 }
  0x30   : > { %1972 = vmatpush3.bf16.msra.mxu1 %v1969_v22  ;;  %v2013_v22 = vpack.c.bf16 %v1328_v21, %v1327_v20  ;;  %v1352_v20 = vld [vmem:[%s2737_s5 + $0x80] sm:$0xff]  ;;  %v1353_v21 = vld [vmem:[%s2737_s5 + $0x88] sm:$0xff] }
  0x31   : > { %1944 = vmatpush3.bf16.msra.mxu0 %v1941_v61  ;;  %1974 = vmatprep.subr.bf16.mxu1 %v1973_v25 }
  0x32   : > { %1946 = vmatprep.subr.bf16.mxu0 %v1945_v1 }
  0x34   : > { %1976 = vmatpush3.bf16.msra.mxu1 %v1973_v25  ;;  %v2017_v25 = vpack.c.bf16 %v1330_v24, %v1329_v23  ;;  %v1318_v23 = vld [vmem:[%s2736_s4] ss:$0 sm:$0xff] }
  0x35   : > { %1948 = vmatpush3.bf16.msra.mxu0 %v1945_v1  ;;  %1978 = vmatprep.subr.bf16.mxu1 %v1977_v28 }
  0x36   : > { %1950 = vmatprep.subr.bf16.mxu0 %v1949_v4 }
  0x38   : > { %1980 = vmatpush3.bf16.msra.mxu1 %v1977_v28  ;;  %v2021_v28 = vpack.c.bf16 %v1332_v27, %v1331_v26 }
  0x39   : > { %1952 = vmatpush3.bf16.msra.mxu0 %v1949_v4  ;;  %1982 = vmatprep.subr.bf16.mxu1 %v1981_v31 }
  0x3a   : > { %1954 = vmatprep.subr.bf16.mxu0 %v1953_v7 }
  0x3c   : > { %1984 = vmatpush3.bf16.msra.mxu1 %v1981_v31  ;;  %v2025_v31 = vpack.c.bf16 %v1334_v30, %v1333_v29 }
  0x3d   : > { %1956 = vmatpush3.bf16.msra.mxu0 %v1953_v7  ;;  %1986 = vmatprep.subr.bf16.mxu1 %v1985_v34  ;;  %v1321_v7 = vld [vmem:[%s2735_s3 + $0x90] sm:$0xff] }
  0x3e   : > { %1958 = vmatprep.subr.bf16.mxu0 %v1957_v10  ;;  %v2001_v11 = vpack.c.bf16 %v1322_v8, %v1321_v7  ;;  %v920_v7 = vld [vmem:[%s2737_s5 + $0x48] sm:$0xff] }
  0x40   : > { %1988 = vmatpush3.bf16.msra.mxu1 %v1985_v34  ;;  %v2029_v34 = vpack.c.bf16 %v1336_v33, %v1335_v32 }
  0x41   : > { %1960 = vmatpush3.bf16.msra.mxu0 %v1957_v10  ;;  %1990 = vmatprep.subr.bf16.mxu1 %v1989_v37 }
  0x42   : > { %1962 = vmatprep.subr.bf16.mxu0 %v1961_v13 }
  0x44   : > { %1992 = vmatpush3.bf16.msra.mxu1 %v1989_v37  ;;  %v2033_v37 = vpack.c.bf16 %v1338_v36, %v1337_v35 }
  0x45   : > { %1964 = vmatpush3.bf16.msra.mxu0 %v1961_v13  ;;  %1994 = vmatprep.subr.bf16.mxu1 %v1993_v40  ;;  %v1324_v13 = vld [vmem:[%s2735_s3 + $0xa8] sm:$0xff] }
  0x48   : > { %1657 = vmatmul.mubr.f32.vlgmr.msra.gmra.mrb[0].mxu0 %v482_v14  ;;  %1996 = vmatpush3.bf16.msra.mxu1 %v1993_v40  ;;  %v2005_v14 = vpack.c.bf16 %v1324_v13, %v1323_v12  ;;  %v923_v12 = vld [vmem:[%s2737_s5 + $0x60] sm:$0xff]  ;;  %v924_v13 = vld [vmem:[%s2737_s5 + $0x68] sm:$0xff] }
  0x49   : > { %1998 = vmatprep.subr.bf16.mxu1 %v1997_v43 }
  0xfe   : > { %v1588_v44 = vpop.f32.mrb[0].mxu1 }
  0xff   : > { %v376_v45 = vpop.f32.mrb[1].mxu1  ;;  %v382_v47 = vadd.f32 %v1588_v44, %v1285_v46 }
 0x100   : > { %v377_v48 = vadd.f32 %v1285_v46, %v376_v45  ;;  %v1343_v45 = vld [vmem:[%s2735_s3 + $0x140] sm:$0xff]  ;;  %v1344_v46 = vld [vmem:[%s2735_s3 + $0x148] sm:$0xff] }
 0x11b   : > { %v1658_v49 = vpop.f32.mrb[0].mxu0 }
 0x11c   : > { %v2158_v50 = vadd.f32 %v1658_v49, %v382_v47  ;;  %v566_v51 = vpop.f32.mrb[1].mxu0  ;;  %v2045_v47 = vpack.c.bf16 %v1344_v46, %v1343_v45  ;;  %v1346_v49 = vld [vmem:[%s2735_s3 + $0x158] sm:$0xff]  ;;  %v1354_v46 = vld [vmem:[%s2737_s5 + $0x90] sm:$0xff] }
 0x11d   : > { %v2160_v52 = vadd.f32 %v566_v51, %v377_v48  ;;  %v1345_v48 = vld [vmem:[%s2735_s3 + $0x150] sm:$0xff]  ;;  %v1347_v51 = vld [vmem:[%s2735_s3 + $0x160] sm:$0xff] }
 0x11e   : > { %v578_v53 = vmin.f32 %v2158_v50, 20.0 }
 0x11f   : > { %v577_v54 = vmin.f32 %v2160_v52, 20.0 }
 0x120   : > { %v581_v55 = vmul.f32 1.442695, %v578_v53 }
 0x121   : > { %v579_v56 = vmul.f32 1.442695, %v577_v54  ;;  %v1349_v54 = vld [vmem:[%s2735_s3 + $0x170] sm:$0xff] }
 0x122   : > { %2184 = vpow2.f32 %v581_v55  ;;  %v1350_v55 = vld [vmem:[%s2735_s3 + $0x178] sm:$0xff] }
 0x123   : > { %2186 = vpow2.f32 %v579_v56  ;;  %v2057_v56 = vpack.c.bf16 %v1350_v55, %v1349_v54  ;;  %v1358_v54 = vld [vmem:[%s2737_s5 + $0xb0] sm:$0xff]  ;;  %v1359_v55 = vld [vmem:[%s2737_s5 + $0xb8] sm:$0xff] }
 0x12c   : > { %v2185_v57 = vpop.eup %2184 }
 0x12d   : > { %v2187_v58 = vpop.eup %2186  ;;  %v584_v59 = vadd.f32 2.0, %v2185_v57 }
 0x12e   : > { %v583_v60 = vadd.f32 2.0, %v2187_v58 }
 0x12f   : > { %v586_v61 = vmul.f32 %v2185_v57, %v584_v59  ;;  %v912_v59 = vld [vmem:[%s2737_s5 + $0x8] sm:$0xff] }
 0x130   : > { %v585_v62 = vmul.f32 %v2187_v58, %v583_v60  ;;  %v911_v58 = vld [vmem:[%s2737_s5] sm:$0xff] }
 0x131   : > { %v588_v63 = vadd.f32 2.0, %v586_v61  ;;  %v2061_v60 = vpack.c.bf16 %v912_v59, %v911_v58  ;;  %v1361_v58 = vld [vmem:[%s2737_s5 + $0xc8] sm:$0xff] }
 0x132   : > { %v587_v0 = vadd.f32 2.0, %v585_v62 }
 0x133   : > { %2188 = vrcp.f32 %v588_v63  ;;  %2062 = vmatprep.subr.bf16.mxu0 %v2061_v60 }
 0x134   : > { %2190 = vrcp.f32 %v587_v0  ;;  %2064 = vmatpush3.bf16.msra.mxu0 %v2061_v60  ;;  %v915_v0 = vld [vmem:[%s2737_s5 + $0x20] sm:$0xff]  ;;  %v1362_v60 = vld [vmem:[%s2737_s5 + $0xd0] sm:$0xff] }
 0x13d   : > { %v2189_v1 = vpop.eup %2188 }
 0x13e   : > { %v2191_v2 = vpop.eup %2190  ;;  %v592_v3 = vmul.f32 %v2189_v1, %v586_v61  ;;  %v913_v61 = vld [vmem:[%s2737_s5 + $0x10] sm:$0xff]  ;;  %v916_v1 = vld [vmem:[%s2737_s5 + $0x28] sm:$0xff] }
 0x13f   : > { %v590_v4 = vmul.f32 %v2191_v2, %v585_v62  ;;  %v914_v62 = vld [vmem:[%s2737_s5 + $0x18] sm:$0xff]  ;;  %v2069_v2 = vpack.c.bf16 %v916_v1, %v915_v0  ;;  %v1365_v0 = vld [vmem:[%s2737_s5 + $0xe8] sm:$0xff] }
 0x140   : > { %v594_v5 = vmul.f32 %v2158_v50, %v592_v3  ;;  %v2049_v50 = vpack.c.bf16 %v1346_v49, %v1345_v48  ;;  %v2065_v63 = vpack.c.bf16 %v914_v62, %v913_v61  ;;  %v917_v3 = vld [vmem:[%s2737_s5 + $0x30] sm:$0xff]  ;;  %v1363_v61 = vld [vmem:[%s2737_s5 + $0xd8] sm:$0xff] }
 0x141   : > { %v593_v6 = vmul.f32 %v2160_v52, %v590_v4  ;;  %v1348_v52 = vld [vmem:[%s2735_s3 + $0x168] sm:$0xff]  ;;  %v918_v4 = vld [vmem:[%s2737_s5 + $0x38] sm:$0xff]  ;;  %v2113_v62 = vpack.c.bf16 %v1363_v61, %v1362_v60 }
 0x142   : > { %596 = vst [vmem:[#allocation2 + $0x9] sm:$0xff] %v594_v5  ;;  %v2053_v53 = vpack.c.bf16 %v1348_v52, %v1347_v51  ;;  %2066 = vmatprep.subr.bf16.mxu0 %v2065_v63  ;;  %v1356_v51 = vld [vmem:[%s2737_s5 + $0xa0] sm:$0xff]  ;;  %v1357_v52 = vld [vmem:[%s2737_s5 + $0xa8] sm:$0xff] }
 0x143   : > { %595 = vst [vmem:[#allocation2 + $0x1] sm:$0xff] %v593_v6  ;;  %2068 = vmatpush3.bf16.msra.mxu0 %v2065_v63  ;;  %v1364_v63 = vld [vmem:[%s2737_s5 + $0xe0] sm:$0xff] }
 0x144   : > { %2070 = vmatprep.subr.bf16.mxu0 %v2069_v2  ;;  %v2117_v1 = vpack.c.bf16 %v1365_v0, %v1364_v63 }
 0x147   : > { %2072 = vmatpush3.bf16.msra.mxu0 %v2069_v2  ;;  %v1366_v2 = vld [vmem:[%s2737_s5 + $0xf0] sm:$0xff] }
 0x149   : > { %v794_v57 = vld [vmem:[#allocation2 + $0xa] sm:$0xff] }
 0x14a   : > { %v597_v9 = vld [vmem:[#allocation2] sm:$0xff]  ;;  %v598_v10 = vld [vmem:[#allocation2 + $0x8] sm:$0xff] }
 0x14b   : > { %1691 = vmatprep.mubr.f32.mxu1 %v597_v9  ;;  %v793_v40 = vld [vmem:[#allocation2 + $0x2] sm:$0xff]  ;;  %v921_v9 = vld [vmem:[%s2737_s5 + $0x50] sm:$0xff] }
 0x14c   : > { %1692 = vmatmul.mubr.f32.vlgmr.msra.gmra.mrb[2].mxu1 %v598_v10  ;;  %v922_v10 = vld [vmem:[%s2737_s5 + $0x58] sm:$0xff] }
 0x14d   : > { %2000 = vmatpush3.bf16.msra.mxu1 %v1997_v43  ;;  %1726 = vmatprep.mubr.f32.mxu1 %v593_v6  ;;  %v1342_v43 = vld [vmem:[%s2735_s3 + $0x138] sm:$0xff]  ;;  %v919_v6 = vld [vmem:[%s2737_s5 + $0x40] sm:$0xff] }
 0x14e   : > { %2002 = vmatprep.subr.bf16.mxu1 %v2001_v11  ;;  %v2041_v44 = vpack.c.bf16 %v1342_v43, %v1341_v42  ;;  %v2077_v8 = vpack.c.bf16 %v920_v7, %v919_v6  ;;  %v1369_v6 = vld [vmem:[%s2737_s5 + $0x108] sm:$0xff] }
 0x151   : > { %2004 = vmatpush3.bf16.msra.mxu1 %v2001_v11  ;;  %v2081_v11 = vpack.c.bf16 %v922_v10, %v921_v9  ;;  %v1371_v9 = vld [vmem:[%s2737_s5 + $0x118] sm:$0xff] }
 0x152   : > { %2006 = vmatprep.subr.bf16.mxu1 %v2005_v14 }
 0x155   : > { %2008 = vmatpush3.bf16.msra.mxu1 %v2005_v14  ;;  %v2085_v14 = vpack.c.bf16 %v924_v13, %v923_v12  ;;  %v1373_v12 = vld [vmem:[%s2737_s5 + $0x128] sm:$0xff] }
 0x156   : > { %2010 = vmatprep.subr.bf16.mxu1 %v2009_v19 }
 0x159   : > { %2012 = vmatpush3.bf16.msra.mxu1 %v2009_v19  ;;  %v2089_v19 = vpack.c.bf16 %v926_v17, %v925_v16  ;;  %v1374_v16 = vld [vmem:[%s2737_s5 + $0x130] sm:$0xff]  ;;  %v1375_v17 = vld [vmem:[%s2737_s5 + $0x138] sm:$0xff] }
 0x15a   : > { %2014 = vmatprep.subr.bf16.mxu1 %v2013_v22 }
 0x15d   : > { %2016 = vmatpush3.bf16.msra.mxu1 %v2013_v22  ;;  %v2093_v22 = vpack.c.bf16 %v1353_v21, %v1352_v20  ;;  %v1376_v20 = vld [vmem:[%s2737_s5 + $0x140] sm:$0xff]  ;;  %v1377_v21 = vld [vmem:[%s2737_s5 + $0x148] sm:$0xff] }
 0x15e   : > { %2018 = vmatprep.subr.bf16.mxu1 %v2017_v25 }
 0x161   : > { %2020 = vmatpush3.bf16.msra.mxu1 %v2017_v25 }
 0x162   : > { %2022 = vmatprep.subr.bf16.mxu1 %v2021_v28 }
 0x165   : > { %2024 = vmatpush3.bf16.msra.mxu1 %v2021_v28 }
 0x166   : > { %2026 = vmatprep.subr.bf16.mxu1 %v2025_v31 }
 0x169   : > { %2028 = vmatpush3.bf16.msra.mxu1 %v2025_v31 }
 0x16a   : > { %2030 = vmatprep.subr.bf16.mxu1 %v2029_v34 }
 0x16c   : > { %1727 = vmatmul.mubr.f32.vlgmr.msra.gmra.mrb[2].mxu1 %v594_v5  ;;  %v2073_v5 = vpack.c.bf16 %v918_v4, %v917_v3  ;;  %v1367_v3 = vld [vmem:[%s2737_s5 + $0xf8] sm:$0xff] }
 0x16d   : > { %2032 = vmatpush3.bf16.msra.mxu1 %v2029_v34  ;;  %1761 = vmatprep.mubr.f32.mxu1 %v793_v40  ;;  %v2121_v4 = vpack.c.bf16 %v1367_v3, %v1366_v2 }
 0x16e   : > { %2034 = vmatprep.subr.bf16.mxu1 %v2033_v37  ;;  %2074 = vmatprep.subr.bf16.mxu0 %v2073_v5 }
 0x16f   : > { %2076 = vmatpush3.bf16.msra.mxu0 %v2073_v5  ;;  %v1368_v5 = vld [vmem:[%s2737_s5 + $0x100] sm:$0xff] }
 0x170   : > { %2078 = vmatprep.subr.bf16.mxu0 %v2077_v8  ;;  %v2125_v7 = vpack.c.bf16 %v1369_v6, %v1368_v5 }
 0x171   : > { %2036 = vmatpush3.bf16.msra.mxu1 %v2033_v37 }
 0x172   : > { %2038 = vmatprep.subr.bf16.mxu1 %v2037_v41 }
 0x173   : > { %2080 = vmatpush3.bf16.msra.mxu0 %v2077_v8  ;;  %v1370_v8 = vld [vmem:[%s2737_s5 + $0x110] sm:$0xff] }
 0x174   : > { %2082 = vmatprep.subr.bf16.mxu0 %v2081_v11  ;;  %v2129_v10 = vpack.c.bf16 %v1371_v9, %v1370_v8 }
 0x175   : > { %2040 = vmatpush3.bf16.msra.mxu1 %v2037_v41 }
 0x176   : > { %2042 = vmatprep.subr.bf16.mxu1 %v2041_v44 }
 0x177   : > { %2084 = vmatpush3.bf16.msra.mxu0 %v2081_v11  ;;  %v1372_v11 = vld [vmem:[%s2737_s5 + $0x120] sm:$0xff] }
 0x178   : > { %2086 = vmatprep.subr.bf16.mxu0 %v2085_v14 }
 0x179   : > { %2044 = vmatpush3.bf16.msra.mxu1 %v2041_v44 }
 0x17a   : > { %2046 = vmatprep.subr.bf16.mxu1 %v2045_v47 }
 0x17b   : > { %2088 = vmatpush3.bf16.msra.mxu0 %v2085_v14  ;;  %v2133_v14 = vpack.c.bf16 %v1373_v12, %v1372_v11 }
 0x17c   : > { %2090 = vmatprep.subr.bf16.mxu0 %v2089_v19 }
 0x17d   : > { %2048 = vmatpush3.bf16.msra.mxu1 %v2045_v47  ;;  %v1355_v47 = vld [vmem:[%s2737_s5 + $0x98] sm:$0xff] }
 0x17e   : > { %2050 = vmatprep.subr.bf16.mxu1 %v2049_v50 }
 0x17f   : > { %2092 = vmatpush3.bf16.msra.mxu0 %v2089_v19  ;;  %v2137_v19 = vpack.c.bf16 %v1375_v17, %v1374_v16 }
 0x180   : > { %2094 = vmatprep.subr.bf16.mxu0 %v2093_v22 }
 0x181   : > { %2052 = vmatpush3.bf16.msra.mxu1 %v2049_v50  ;;  %v2097_v50 = vpack.c.bf16 %v1355_v47, %v1354_v46 }
 0x182   : > { %2054 = vmatprep.subr.bf16.mxu1 %v2053_v53 }
 0x185   : > { %2056 = vmatpush3.bf16.msra.mxu1 %v2053_v53  ;;  %v2101_v53 = vpack.c.bf16 %v1357_v52, %v1356_v51 }
 0x186   : > { %2058 = vmatprep.subr.bf16.mxu1 %v2057_v56 }
 0x189   : > { %2060 = vmatpush3.bf16.msra.mxu1 %v2057_v56  ;;  %v2105_v56 = vpack.c.bf16 %v1359_v55, %v1358_v54 }
 0x18c   : > { %1762 = vmatmul.mubr.f32.vlgmr.msra.gmra.mrb[2].mxu1 %v794_v57  ;;  %v1360_v57 = vld [vmem:[%s2737_s5 + $0xc0] sm:$0xff] }
 0x18d   : > { %v2109_v59 = vpack.c.bf16 %v1361_v58, %v1360_v57 }
 0x25f   : > { %v1763_v24 = vpop.f32.mrb[2].mxu1 }
 0x260   : > { %v2161_v25 = vadd.f32 %v1763_v24, %v1318_v23  ;;  %v878_v26 = vpop.f32.mrb[3].mxu1  ;;  %v1379_v24 = vld [vmem:[%s2737_s5 + $0x158] sm:$0xff] }
 0x261   : > { %v2162_v27 = vadd.f32 %v1318_v23, %v878_v26  ;;  %v1378_v23 = vld [vmem:[%s2737_s5 + $0x150] sm:$0xff]  ;;  %v1380_v26 = vld [vmem:[%s2737_s5 + $0x160] sm:$0xff] }
 0x262   : > { %v890_v28 = vmin.f32 %v2161_v25, 20.0 }
 0x263   : > { %v889_v29 = vmin.f32 %v2162_v27, 20.0 }
 0x264   : > { %v893_v30 = vmul.f32 1.442695, %v890_v28 }
 0x265   : > { %v891_v31 = vmul.f32 1.442695, %v889_v29  ;;  %v1382_v29 = vld [vmem:[%s2737_s5 + $0x170] sm:$0xff] }
 0x266   : > { %2192 = vpow2.f32 %v893_v30  ;;  %v1383_v30 = vld [vmem:[%s2737_s5 + $0x178] sm:$0xff] }
 0x267   : > { %2194 = vpow2.f32 %v891_v31  ;;  %v2153_v31 = vpack.c.bf16 %v1383_v30, %v1382_v29 }
 0x270   : > { %v2193_v32 = vpop.eup %2192 }
 0x271   : > { %v2195_v33 = vpop.eup %2194  ;;  %v896_v34 = vadd.f32 2.0, %v2193_v32 }
 0x272   : > { %v895_v35 = vadd.f32 2.0, %v2195_v33 }
 0x273   : > { %v898_v36 = vmul.f32 %v2193_v32, %v896_v34 }
 0x274   : > { %v897_v37 = vmul.f32 %v2195_v33, %v895_v35  ;;  %v1351_v33 = vld [vmem:[%s2738_s6] ss:$0 sm:$0xff] }
 0x275   : > { %v900_v38 = vadd.f32 2.0, %v898_v36 }
 0x276   : > { %v899_v39 = vadd.f32 2.0, %v897_v37 }
 0x277   : > { %2196 = vrcp.f32 %v900_v38 }
 0x278   : > { %2198 = vrcp.f32 %v899_v39 }
 0x281   : > { %v2197_v40 = vpop.eup %2196 }
 0x282   : > { %v2199_v41 = vpop.eup %2198  ;;  %v904_v42 = vmul.f32 %v2197_v40, %v898_v36 }
 0x283   : > { %v902_v43 = vmul.f32 %v2199_v41, %v897_v37 }
 0x284   : > { %v906_v44 = vmul.f32 %v2161_v25, %v904_v42  ;;  %v2145_v25 = vpack.c.bf16 %v1379_v24, %v1378_v23 }
 0x285   : > { %v905_v45 = vmul.f32 %v2162_v27, %v902_v43  ;;  %v1381_v27 = vld [vmem:[%s2737_s5 + $0x168] sm:$0xff] }
 0x286   : > { %908 = vst [vmem:[#allocation2 + $0x9] sm:$0xff] %v906_v44  ;;  %v2149_v28 = vpack.c.bf16 %v1381_v27, %v1380_v26 }
 0x287   : > { %907 = vst [vmem:[#allocation2 + $0x1] sm:$0xff] %v905_v45 }
 0x28d   : > { %v1106_v32 = vld [vmem:[#allocation2 + $0xa] sm:$0xff] }
 0x28e   : > { %v909_v48 = vld [vmem:[#allocation2] sm:$0xff]  ;;  %v910_v49 = vld [vmem:[#allocation2 + $0x8] sm:$0xff] }
 0x28f   : > { %1796 = vmatprep.mubr.f32.mxu0 %v909_v48  ;;  %v1105_v13 = vld [vmem:[#allocation2 + $0x2] sm:$0xff] }
 0x290   : > { %1797 = vmatmul.mubr.f32.vlgmr.msra.gmra.mrb[2].mxu0 %v910_v49 }
 0x291   : > { %2096 = vmatpush3.bf16.msra.mxu0 %v2093_v22  ;;  %1831 = vmatprep.mubr.f32.mxu0 %v905_v45  ;;  %v2141_v22 = vpack.c.bf16 %v1377_v21, %v1376_v20 }
 0x292   : > { %2098 = vmatprep.subr.bf16.mxu0 %v2097_v50 }
 0x295   : > { %2100 = vmatpush3.bf16.msra.mxu0 %v2097_v50 }
 0x296   : > { %2102 = vmatprep.subr.bf16.mxu0 %v2101_v53 }
 0x299   : > { %2104 = vmatpush3.bf16.msra.mxu0 %v2101_v53 }
 0x29a   : > { %2106 = vmatprep.subr.bf16.mxu0 %v2105_v56 }
 0x29d   : > { %2108 = vmatpush3.bf16.msra.mxu0 %v2105_v56 }
 0x29e   : > { %2110 = vmatprep.subr.bf16.mxu0 %v2109_v59 }
 0x2a1   : > { %2112 = vmatpush3.bf16.msra.mxu0 %v2109_v59 }
 0x2a2   : > { %2114 = vmatprep.subr.bf16.mxu0 %v2113_v62 }
 0x2a5   : > { %2116 = vmatpush3.bf16.msra.mxu0 %v2113_v62 }
 0x2a6   : > { %2118 = vmatprep.subr.bf16.mxu0 %v2117_v1 }
 0x2a9   : > { %2120 = vmatpush3.bf16.msra.mxu0 %v2117_v1 }
 0x2aa   : > { %2122 = vmatprep.subr.bf16.mxu0 %v2121_v4 }
 0x2ad   : > { %2124 = vmatpush3.bf16.msra.mxu0 %v2121_v4 }
 0x2ae   : > { %2126 = vmatprep.subr.bf16.mxu0 %v2125_v7 }
 0x2b0   : > { %1832 = vmatmul.mubr.f32.vlgmr.msra.gmra.mrb[2].mxu0 %v906_v44 }
 0x2b1   : > { %2128 = vmatpush3.bf16.msra.mxu0 %v2125_v7  ;;  %1866 = vmatprep.mubr.f32.mxu0 %v1105_v13 }
 0x2b2   : > { %2130 = vmatprep.subr.bf16.mxu0 %v2129_v10 }
 0x2b5   : > { %2132 = vmatpush3.bf16.msra.mxu0 %v2129_v10 }
 0x2b6   : > { %2134 = vmatprep.subr.bf16.mxu0 %v2133_v14 }
 0x2b9   : > { %2136 = vmatpush3.bf16.msra.mxu0 %v2133_v14 }
 0x2ba   : > { %2138 = vmatprep.subr.bf16.mxu0 %v2137_v19 }
 0x2bd   : > { %2140 = vmatpush3.bf16.msra.mxu0 %v2137_v19 }
 0x2be   : > { %2142 = vmatprep.subr.bf16.mxu0 %v2141_v22 }
 0x2c1   : > { %2144 = vmatpush3.bf16.msra.mxu0 %v2141_v22 }
 0x2c2   : > { %2146 = vmatprep.subr.bf16.mxu0 %v2145_v25 }
 0x2c5   : > { %2148 = vmatpush3.bf16.msra.mxu0 %v2145_v25 }
 0x2c6   : > { %2150 = vmatprep.subr.bf16.mxu0 %v2149_v28 }
 0x2c9   : > { %2152 = vmatpush3.bf16.msra.mxu0 %v2149_v28 }
 0x2ca   : > { %2154 = vmatprep.subr.bf16.mxu0 %v2153_v31 }
 0x2cd   : > { %2156 = vmatpush3.bf16.msra.mxu0 %v2153_v31 }
 0x2d0   : > { %1867 = vmatmul.mubr.f32.vlgmr.msra.gmra.mrb[2].mxu0 %v1106_v32 }
 0x3a3   : > { %v1868_v34 = vpop.f32.mrb[2].mxu0 }
 0x3a4   : > { %v2163_v35 = vadd.f32 %v1868_v34, %v1351_v33  ;;  %v1190_v36 = vpop.f32.mrb[3].mxu0 }
 0x3a5   : > { %v2164_v37 = vadd.f32 %v1351_v33, %v1190_v36 }
 0x3a6   : > { %v1385_v38 = vmul.f32 -1.442695, %v2163_v35  ;;  %v1216_v47 = vadd.f32 %v2163_v35, %v2313_v18 }
 0x3a7   : > { %v1384_v39 = vmul.f32 -1.442695, %v2164_v37  ;;  %v1215_v49 = vadd.f32 %v2164_v37, %v2303_v15 }
 0x3a8   : > { %2200 = vpow2.f32 %v1385_v38 }
 0x3a9   : > { %2202 = vpow2.f32 %v1384_v39 }
 0x3b2   : > { %v2201_v40 = vpop.eup %2200 }
 0x3b3   : > { %v2203_v41 = vpop.eup %2202  ;;  %v1208_v42 = vadd.f32 1.0, %v2201_v40 }
 0x3b4   : > { %v1207_v43 = vadd.f32 1.0, %v2203_v41 }
 0x3b5   : > { %2204 = vrcp.f32 %v1208_v42 }
 0x3b6   : > { %2206 = vrcp.f32 %v1207_v43 }
 0x3bf   : > { %v2205_v44 = vpop.eup %2204 }
 0x3c0   : > { %v2207_v45 = vpop.eup %2206  ;;  %v1387_v46 = vadd.f32 -0.5, %v2205_v44 }
 0x3c1   : > { %v1386_v48 = vadd.f32 -0.5, %v2207_v45 }
 0x3c2   : > { %v1218_v50 = vmul.f32 %v1387_v46, %v1216_v47 }
 0x3c3   : > { %v1217_v51 = vmul.f32 %v1386_v48, %v1215_v49 }
 0x3c4   : > { %1220 = vst [vmem:[%s278_s23 + $0x8] sm:$0xff] %v1218_v50 }
 0x3c5   : > { %1219 = vst [vmem:[%s278_s23] sm:$0xff] %v1217_v51 }
 0x3c6 PF: > { %s17_s24 = sadd.s32 1, %s2214_s24  }
 0x3c7   : > { %p14_p4 = scmp.ge.s32.totalorder %s17_s24, 4  }
 0x3c9   :  { %16 = sbr.rel (!%p14_p4) target bundleno = 1 (0x1), region = 84 }

</bundles_post_ra>
